<compile_context>
chip_gen: v7x
topology: tpu7x:2x2x1
jax: 0.10.0
libtpu: 0.0.40
codegen_flags: <defaults>
</compile_context>

<pallas_src>
import functools

import jax
import jax.numpy as jnp
from jax.experimental import pallas as pl
from jax.experimental.pallas import tpu as pltpu

_LANE = 128
# dtype itemsize -> required sublane multiple for dense (unmasked) tiling
_SUBLANE_BY_ITEMSIZE = {1: 32, 2: 16, 4: 8, 8: 8}


# ----------------------------------------------------------------------------
# Pallas kernel: standard LayerNorm over the last (hidden) dimension.
# ----------------------------------------------------------------------------
def _layer_norm_kernel(x_ref, gamma_ref, beta_ref, o_ref, *, eps, inv_d):
    # x_ref:     (tile_b, D_pad)  block of cls embeddings
    # gamma_ref: (1, D_pad)       LayerNorm weight (broadcast over batch)
    # beta_ref:  (1, D_pad)       LayerNorm bias   (broadcast over batch)
    x = x_ref[...].astype(jnp.float32)
    # Single-pass statistics: both reductions are independent -> XLU/VALU overlap.
    # inv_d = 1/D (the *unpadded* hidden size); zero-padded columns contribute
    # nothing to either sum, so the statistics are exact.
    s1 = jnp.sum(x, axis=-1, keepdims=True)
    s2 = jnp.sum(x * x, axis=-1, keepdims=True)
    mean = s1 * inv_d
    var = s2 * inv_d - mean * mean
    var = jnp.maximum(var, 0.0)  # guard against cancellation going negative
    inv = jax.lax.rsqrt(var + eps)
    y = (x - mean) * inv * gamma_ref[...].astype(jnp.float32) \
        + beta_ref[...].astype(jnp.float32)
    o_ref[...] = y.astype(o_ref.dtype)


# ----------------------------------------------------------------------------
# Hardware-aware tiling policy.
# ----------------------------------------------------------------------------
def _tpu_vmem_and_cores():
    """Best-effort query of per-TensorCore VMEM capacity and TC count."""
    vmem = 128 << 20
    try:
        info = pltpu.get_tpu_info()
        vmem = int(getattr(info, "vmem_capacity_bytes", vmem))
    except Exception:
        pass
    # Heuristic: 64 MiB-per-TC parts (v7x) have 2 TensorCores per chip;
    # 128 MiB parts (v5e/v6e) have 1.
    num_cores = 2 if vmem <= (64 << 20) else 1
    return vmem, num_cores


def _round_up(x, m):
    return ((x + m - 1) // m) * m


def _choose_tile_b(B, D_pad, dtype, *, vmem_capacity, num_cores, max_tile=8192):
    """Pick the largest dtype-aligned batch tile whose 4 double-buffered main
    blocks (x in + y out) fit the generation-aware VMEM working budget."""
    itemsize = jnp.dtype(dtype).itemsize
    sublane = _SUBLANE_BY_ITEMSIZE.get(itemsize, 8)

    if vmem_capacity >= (96 << 20):      # v5e / v6e: 128 MiB VMEM per TC
        work_budget = 64 << 20
    else:                                # v7x: 64 MiB VMEM per TC
        work_budget = 40 << 20

    per_block_budget = work_budget // 4            # x + out, double-buffered
    bytes_per_row = max(D_pad * itemsize, 1)
    b_cap = _round_up(B, sublane)                  # no point exceeding the batch

    tile_b = per_block_budget // bytes_per_row
    tile_b = min(tile_b, max_tile, b_cap)
    tile_b = max((tile_b // sublane) * sublane, sublane)

    # Only 2-TensorCore parts (v7x) benefit from splitting a batch that would
    # otherwise fit in one block; on single-TC chips the grid is a serial loop.
    if num_cores > 1 and B > sublane:
        if tile_b >= B:
            tile_b = max(_round_up((B + 1) // 2, sublane), sublane)
        else:
            grid = -(-B // tile_b)
            if grid % num_cores != 0:
                target_grid = _round_up(grid, num_cores)
                t = _round_up(-(-B // target_grid), sublane)
                if t >= sublane and -(-B // t) == target_grid:
                    tile_b = t
    return tile_b


# ----------------------------------------------------------------------------
# Wrapper: pallas_call plumbing (lane padding, VMEM limit, grid).
# ----------------------------------------------------------------------------
def layer_norm_pallas(x, gamma, beta, *, eps=1e-5, tile_b=None):
    """LayerNorm(x) over last dim; x: [B, D], gamma/beta: [D]."""
    B, D = x.shape
    vmem_capacity, num_cores = _tpu_vmem_and_cores()

    # Keep the output lane-dense: pad hidden dim to a multiple of 128.
    D_pad = _round_up(D, _LANE)
    if D_pad != D:
        x_in = jnp.pad(x, ((0, 0), (0, D_pad - D)))
        gamma_in = jnp.pad(gamma, (0, D_pad - D), constant_values=1.0)
        beta_in = jnp.pad(beta, (0, D_pad - D))
    else:
        x_in, gamma_in, beta_in = x, gamma, beta

    sublane = _SUBLANE_BY_ITEMSIZE.get(jnp.dtype(x.dtype).itemsize, 8)
    if tile_b is None:
        tile_b = _choose_tile_b(B, D_pad, x.dtype,
                                vmem_capacity=vmem_capacity,
                                num_cores=num_cores)
    else:
        assert tile_b % sublane == 0, (
            f"tile_b={tile_b} must be a multiple of {sublane} for dtype {x.dtype}")

    grid = (B + tile_b - 1) // tile_b              # ragged last block is OK
    gamma2 = gamma_in.reshape(1, D_pad)
    beta2 = beta_in.reshape(1, D_pad)

    itemsize = jnp.dtype(x.dtype).itemsize
    main_bytes = 4 * tile_b * D_pad * itemsize     # x + out, double-buffered
    param_bytes = 4 * D_pad * jnp.dtype(gamma2.dtype).itemsize
    headroom = max(main_bytes // 2, 8 << 20)       # Mosaic scratch / f32 temps
    if vmem_capacity >= (96 << 20):
        vmem_cap = min(int(vmem_capacity * 0.75), 100 << 20)   # v5e/v6e
    else:
        vmem_cap = int(vmem_capacity * 0.72)                   # v7x: ~46 MiB
    vmem_limit = int(min(max(main_bytes + param_bytes + headroom, 16 << 20),
                         vmem_cap))

    kernel = functools.partial(_layer_norm_kernel, eps=eps, inv_d=1.0 / D)
    out = pl.pallas_call(
        kernel,
        out_shape=jax.ShapeDtypeStruct((B, D_pad), x.dtype),
        grid=(grid,),
        in_specs=[
            pl.BlockSpec((tile_b, D_pad), lambda i: (i, 0)),
            pl.BlockSpec((1, D_pad), lambda i: (0, 0)),
            pl.BlockSpec((1, D_pad), lambda i: (0, 0)),
        ],
        out_specs=pl.BlockSpec((tile_b, D_pad), lambda i: (i, 0)),
        compiler_params=pltpu.CompilerParams(
            dimension_semantics=("parallel",),
            vmem_limit_bytes=vmem_limit,
        ),
    )(x_in, gamma2, beta2)

    if D_pad != D:
        out = out[:, :D]
    return out


# ----------------------------------------------------------------------------
# JAX-side "module" mirroring NaiveItemTower's forward dispatch.
# ----------------------------------------------------------------------------
class NaiveItemTowerPallas:
    """standard_layer_norm on top of the cls token (Pallas TPU kernel)."""

    def __init__(self, hidden_dim, eps=1e-5):
        self.hidden_dim = hidden_dim
        self.eps = eps
        # Deterministic synthetic LayerNorm parameters (torch default init is
        # weight=1, bias=0; perturb deterministically so the affine part is
        # exercised).  Real trained weights would be loaded here in practice.
        k = jax.random.PRNGKey(0)
        kg, kb = jax.random.split(k)
        self.gamma = (jnp.ones((hidden_dim,), jnp.float32)
                      + 0.01 * jax.random.normal(kg, (hidden_dim,), jnp.float32))
        self.beta = 0.01 * jax.random.normal(kb, (hidden_dim,), jnp.float32)

    def __call__(self, cls=None, text=None, input_step='cls',
                 output_step='embedding', **inputs):
        if input_step in ('inputs', 'text'):
            # TODO(synk): requires running the full cls_model transformer.
            raise NotImplementedError(
                "NaiveItemTowerPallas only supports input_step='cls'")
        if output_step == 'cls':
            return cls
        if output_step == 'embedding':
            return layer_norm_pallas(cls, self.gamma, self.beta, eps=self.eps)
        raise NotImplementedError(
            f"NaiveItemTowerPallas does not support "
            f"{input_step}->{output_step} forward")


# ----------------------------------------------------------------------------
# Reference implementation in plain JAX (for a quick sanity check).
# ----------------------------------------------------------------------------
def layer_norm_ref(x, gamma, beta, eps=1e-5):
    x32 = x.astype(jnp.float32)
    mean = jnp.mean(x32, axis=-1, keepdims=True)
    var = jnp.mean((x32 - mean) ** 2, axis=-1, keepdims=True)
    return ((x32 - mean) * jax.lax.rsqrt(var + eps) * gamma + beta).astype(x.dtype)


if __name__ == "__main__":
    key = jax.random.PRNGKey(0)

    # --- f32 test, ragged batch (B not a multiple of the sublane tile) -------
    batch, hidden = 10, 128
    cls = jax.random.normal(key, (batch, hidden), dtype=jnp.float32)
    tower = NaiveItemTowerPallas(hidden_dim=hidden)

    # cls -> embedding (LayerNorm, Pallas kernel)
    emb = tower(cls=cls, input_step='cls', output_step='embedding')
    emb = jax.block_until_ready(emb)

    # cls -> cls (identity path)
    cls_out = tower(cls=cls, input_step='cls', output_step='cls')
    cls_out = jax.block_until_ready(cls_out)

    ref = layer_norm_ref(cls, tower.gamma, tower.beta)
    assert emb.shape == (batch, hidden)
    assert jnp.max(jnp.abs(emb - ref)) < 1e-4
    assert jnp.array_equal(cls_out, cls)

    # --- bf16 test (dtype-aware sublane tiling, ragged batch) ----------------
    batch_bf, hidden_bf = 20, 128
    cls_bf = jax.random.normal(jax.random.PRNGKey(1),
                               (batch_bf, hidden_bf)).astype(jnp.bfloat16)
    tower_bf = NaiveItemTowerPallas(hidden_dim=hidden_bf)
    emb_bf = tower_bf(cls=cls_bf, input_step='cls', output_step='embedding')
    emb_bf = jax.block_until_ready(emb_bf)
    ref_bf = layer_norm_ref(cls_bf, tower_bf.gamma, tower_bf.beta)
    assert emb_bf.dtype == jnp.bfloat16 and emb_bf.shape == (batch_bf, hidden_bf)
    assert jnp.max(jnp.abs(emb_bf.astype(jnp.float32)
                           - ref_bf.astype(jnp.float32))) < 0.1

    # --- non-lane-multiple hidden dim test (exercises the 128-padding path) --
    batch_p, hidden_p = 12, 100
    cls_p = jax.random.normal(jax.random.PRNGKey(2),
                              (batch_p, hidden_p), dtype=jnp.float32)
    tower_p = NaiveItemTowerPallas(hidden_dim=hidden_p)
    emb_p = tower_p(cls=cls_p, input_step='cls', output_step='embedding')
    emb_p = jax.block_until_ready(emb_p)
    ref_p = layer_norm_ref(cls_p, tower_p.gamma, tower_p.beta)
    assert emb_p.shape == (batch_p, hidden_p)
    assert jnp.max(jnp.abs(emb_p - ref_p)) < 1e-4

    print("KERNEL_OK")
</pallas_src>

<mosaic_0001>
module attributes {stable_mosaic.version = 11 : i64} {
  func.func @_layer_norm_kernel(%arg0: i32, %arg1: memref<16x128xf32, #tpu.memory_space<vmem>>, %arg2: memref<1x128xf32, #tpu.memory_space<vmem>>, %arg3: memref<1x128xf32, #tpu.memory_space<vmem>>, %arg4: memref<16x128xf32, #tpu.memory_space<vmem>>) attributes {dimension_semantics = [#tpu.dimension_semantics<parallel>], iteration_bounds = array<i64: 1>, scalar_prefetch = 0 : i64, scratch_operands = 0 : i64, tpu.core_type = #tpu.core_type<tc>, window_params = [{transform_indices = @transform_0, window_bounds = array<i64: 16, 128>}, {pipeline_mode = #tpu.pipeline_mode<synchronous>, transform_indices = @transform_1, window_bounds = array<i64: 1, 128>}, {pipeline_mode = #tpu.pipeline_mode<synchronous>, transform_indices = @transform_2, window_bounds = array<i64: 1, 128>}, {transform_indices = @transform_3, window_bounds = array<i64: 16, 128>}]} {
    %c0 = arith.constant 0 : index
    %c0_0 = arith.constant 0 : index
    %0 = vector.load %arg1[%c0, %c0_0] : memref<16x128xf32, #tpu.memory_space<vmem>>, vector<16x128xf32>
    %cst = arith.constant dense<0.000000e+00> : vector<16xf32>
    %1 = vector.multi_reduction <add>, %0, %cst [1] : vector<16x128xf32> to vector<16xf32>
    %2 = vector.shape_cast %1 : vector<16xf32> to vector<16x1xf32>
    %3 = arith.mulf %0, %0 : vector<16x128xf32>
    %cst_1 = arith.constant dense<0.000000e+00> : vector<16xf32>
    %4 = vector.multi_reduction <add>, %3, %cst_1 [1] : vector<16x128xf32> to vector<16xf32>
    %5 = vector.shape_cast %4 : vector<16xf32> to vector<16x1xf32>
    %cst_2 = arith.constant 7.812500e-03 : f32
    %6 = vector.broadcast %cst_2 : f32 to vector<16x1xf32>
    %7 = arith.mulf %2, %6 : vector<16x1xf32>
    %cst_3 = arith.constant 7.812500e-03 : f32
    %8 = vector.broadcast %cst_3 : f32 to vector<16x1xf32>
    %9 = arith.mulf %5, %8 : vector<16x1xf32>
    %10 = arith.mulf %7, %7 : vector<16x1xf32>
    %11 = arith.subf %9, %10 : vector<16x1xf32>
    %cst_4 = arith.constant 0.000000e+00 : f32
    %12 = vector.broadcast %cst_4 : f32 to vector<16x1xf32>
    %13 = arith.maximumf %11, %12 : vector<16x1xf32>
    %cst_5 = arith.constant 9.99999974E-6 : f32
    %14 = vector.broadcast %cst_5 : f32 to vector<16x1xf32>
    %15 = arith.addf %13, %14 : vector<16x1xf32>
    %16 = math.rsqrt %15 : vector<16x1xf32>
    %17 = vector.broadcast %7 : vector<16x1xf32> to vector<16x128xf32>
    %18 = arith.subf %0, %17 : vector<16x128xf32>
    %19 = vector.broadcast %16 : vector<16x1xf32> to vector<16x128xf32>
    %20 = arith.mulf %18, %19 : vector<16x128xf32>
    %c0_6 = arith.constant 0 : index
    %c0_7 = arith.constant 0 : index
    %21 = vector.load %arg2[%c0_6, %c0_7] : memref<1x128xf32, #tpu.memory_space<vmem>>, vector<1x128xf32>
    %22 = vector.broadcast %21 : vector<1x128xf32> to vector<16x128xf32>
    %23 = arith.mulf %20, %22 : vector<16x128xf32>
    %c0_8 = arith.constant 0 : index
    %c0_9 = arith.constant 0 : index
    %24 = vector.load %arg3[%c0_8, %c0_9] : memref<1x128xf32, #tpu.memory_space<vmem>>, vector<1x128xf32>
    %25 = vector.broadcast %24 : vector<1x128xf32> to vector<16x128xf32>
    %26 = arith.addf %23, %25 : vector<16x128xf32>
    %c0_10 = arith.constant 0 : index
    %c0_11 = arith.constant 0 : index
    %27 = vector.load %arg4[%c0_10, %c0_11] : memref<16x128xf32, #tpu.memory_space<vmem>>, vector<16x128xf32>
    tpu.vector_store %arg4[%c0_10, %c0_11], %26 {strides = array<i32>} : memref<16x128xf32, #tpu.memory_space<vmem>>, vector<16x128xf32>,
    return
  }
  func.func @transform_0(%arg0: i32) -> (i32, i32) {
    %c0_i32 = arith.constant 0 : i32
    %c0_i32_0 = arith.constant 0 : i32
    return %arg0, %c0_i32 : i32, i32
  }
  func.func @transform_1(%arg0: i32) -> (i32, i32) {
    %c0_i32 = arith.constant 0 : i32
    %c0_i32_0 = arith.constant 0 : i32
    %c0_i32_1 = arith.constant 0 : i32
    return %c0_i32, %c0_i32_0 : i32, i32
  }
  func.func @transform_2(%arg0: i32) -> (i32, i32) {
    %c0_i32 = arith.constant 0 : i32
    %c0_i32_0 = arith.constant 0 : i32
    %c0_i32_1 = arith.constant 0 : i32
    return %c0_i32, %c0_i32_0 : i32, i32
  }
  func.func @transform_3(%arg0: i32) -> (i32, i32) {
    %c0_i32 = arith.constant 0 : i32
    %c0_i32_0 = arith.constant 0 : i32
    return %arg0, %c0_i32 : i32, i32
  }
}

</mosaic_0001>

<bundles_post_ra>
// kernel: tpu_custom_call.1
= control target key start
LH: loop header
LB: loop body
LE: loop exit
PB: predicated region body
PF: predicated region fallthrough
CT: control target
= control target key end

     0   :  { %8 = vsyncpa [#allocation3], 0  ;;  %s214_s0 = inlined_call_operand.hbm [shape: f32[10,128], index: 0, kind: input, shape index: {}]   ;;  %s215_s1 = inlined_call_operand.vmem [shape: f32[1,128], index: 1, kind: input, shape index: {}]   ;;  %s216_s2 = inlined_call_operand.vmem [shape: f32[1,128], index: 2, kind: input, shape index: {}]   ;;  %s217_s3 = inlined_call_operand.hbm [shape: f32[10,128], index: 3, kind: output, shape index: {}]  }
   0x1   :  { %9 = vsyncpa [#allocation4], 0  ;;  %s154_s12 = smov [#allocation2]   ;;  %s106_s16 = scalar_lea.hbm %s214_s0, 256 }
   0x2   :  { %s15_s13 = sshll.u32 %s154_s12, 4  ;;  %p107_p0 = scmp.ne.s32.totalorder %s214_s0, %s106_s16  ;;  %s16_s13 = int_to_ptr.vmem [resolvable:$true] %s15_s13 }
   0x3   :  { %p110_p1 = scmp.lt.u32.totalorder %s106_s16, %s214_s0 }
   0x5   :  { %p112_p2 = pnand %p110_p1, %p107_p0 }
   0x7   :  { %115 = shalt.err (!%p112_p2)
}
   0x8   :  { %s116_s21 = scalar_lea.vmem %s16_s13, 256  ;;  %p121_p4 = scmp.lt.s32.totalorder %s16_s13, %s16_s13 }
   0x9   :  { %p117_p3 = scmp.ne.s32.totalorder %s16_s13, %s116_s21  ;;  %p122_p5 = scmp.lt.s32.totalorder %s116_s21, %s116_s21 }
   0xb   :  { %p123_p6 = por %p122_p5, %p121_p4 }
   0xd   :  { %p124_p7 = pnand %p123_p6, %p117_p3 }
   0xf   :  { %127 = shalt.err (!%p124_p7)
}
  0x10   :  { %s155_s22 = smov 128   ;;  %s156_s23 = smov 8  }
  0x11   :  { %21 = dma.hbm_to_vmem [thread:$0]  %s214_s0, 256, %s16_s13, [#allocation3], %s155_s22, %s155_s22, %s156_s23  }
  0x12   :  { %150 = dma.done.wait [#allocation3], 256  }
  0x13   :  { %151 = vsyncadd [#allocation3], 4294967040  ;;  %v29_v0 = vld [vmem:[#allocation2] sm:$0xff]  ;;  %v30_v1 = vld [vmem:[#allocation2 + $0x8] sm:$0xff]  ;;  %s157_s29 = smov [#allocation5]  }
  0x14   :  { %31 = vadd.xlane.f32.xlu0 %v29_v0  ;;  %v35_v2 = vmul.f32 %v29_v0, %v29_v0  ;;  %v36_v3 = vmul.f32 %v30_v1, %v30_v1  ;;  %v96_v22 = vld [vmem:[%s215_s1] ss:$0 sm:$0xff]  ;;  %s84_s30 = sshll.u32 %s157_s29, 4  ;;  %s85_s30 = int_to_ptr.vmem [resolvable:$true] %s84_s30 }
  0x15   :  { %v97_v24 = vld [vmem:[%s216_s2] ss:$0 sm:$0xff]  ;;  %s128_s4 = scalar_lea.vmem %s85_s30, 256  ;;  %p133_p9 = scmp.lt.s32.totalorder %s85_s30, %s85_s30 }
  0x16   :  { %37 = vadd.xlane.f32.xlu1 %v35_v2  ;;  %p129_p8 = scmp.ne.s32.totalorder %s85_s30, %s128_s4  ;;  %p134_p10 = scmp.lt.s32.totalorder %s128_s4, %s128_s4 }
  0x18   :  { %33 = vadd.xlane.f32.xlu0 %v30_v1  ;;  %p135_p11 = por %p134_p10, %p133_p9 }
  0x1a   :  { %39 = vadd.xlane.f32.xlu1 %v36_v3  ;;  %p136_p12 = pnand %p135_p11, %p129_p8 }
  0xa1   :  { %v32_v4 = vpop.xlane.xlu0 %31 }
  0xa2   :  { %v41_v5 = vmul.f32 0.0078125, %v32_v4 }
  0xa3   :  { %v38_v6 = vpop.xlane.xlu1 %37 }
  0xa4   :  { %v45_v7 = vmul.f32 %v41_v5, %v41_v5  ;;  %v43_v8 = vmul.f32 0.0078125, %v38_v6  ;;  %v55_v20 = vsub.f32 %v29_v0, %v41_v5 }
  0xa5   :  { %v34_v9 = vpop.xlane.xlu0 %33 }
  0xa6   :  { %v47_v10 = vsub.f32 %v43_v8, %v45_v7  ;;  %v42_v11 = vmul.f32 0.0078125, %v34_v9 }
  0xa7   :  { %v40_v12 = vpop.xlane.xlu1 %39 }
  0xa8   :  { %v49_v13 = vmax.f32 %v47_v10, 0.0  ;;  %v46_v14 = vmul.f32 %v42_v11, %v42_v11  ;;  %v44_v15 = vmul.f32 0.0078125, %v40_v12  ;;  %v56_v25 = vsub.f32 %v30_v1, %v42_v11 }
  0xaa   :  { %v51_v16 = vadd.f32 1e-05, %v49_v13  ;;  %v48_v17 = vsub.f32 %v44_v15, %v46_v14 }
  0xac   :  { %102 = vrsqrt.f32 %v51_v16  ;;  %v50_v18 = vmax.f32 %v48_v17, 0.0 }
  0xae   :  { %v52_v19 = vadd.f32 1e-05, %v50_v18 }
  0xb0   :  { %104 = vrsqrt.f32 %v52_v19 }
  0xb6   :  { %v103_v21 = vpop.eup %102 }
  0xb7   :  { %v57_v23 = vmul.f32 %v103_v21, %v55_v20 }
  0xb9   :  { %v66_v26 = vmul.f32 %v96_v22, %v57_v23 }
  0xba   :  { %v105_v27 = vpop.eup %104 }
  0xbb   :  { %v58_v28 = vmul.f32 %v105_v27, %v56_v25  ;;  %v75_v29 = vadd.f32 %v97_v24, %v66_v26 }
  0xbd   :  { %v67_v30 = vmul.f32 %v96_v22, %v58_v28  ;;  %77 = vst [vmem:[#allocation5] sm:$0xff] %v75_v29 }
  0xbf   :  { %v76_v31 = vadd.f32 %v97_v24, %v67_v30 }
  0xc1   :  { %78 = vst [vmem:[#allocation5 + $0x8] sm:$0xff] %v76_v31 }
  0xc2   :  { %139 = shalt.err (!%p136_p12)
}
  0xc3   :  { %s140_s5 = scalar_lea.hbm %s217_s3, 256 }
  0xc4   :  { %p141_p13 = scmp.ne.s32.totalorder %s217_s3, %s140_s5  ;;  %p144_p0 = scmp.lt.u32.totalorder %s140_s5, %s217_s3 }
  0xc6   :  { %p146_p1 = pnand %p144_p0, %p141_p13 }
  0xc8   :  { %149 = shalt.err (!%p146_p1)
}
  0xc9   :  { %90 = dma.vmem_to_hbm [thread:$0]  %s85_s30, 256, %s217_s3, [#allocation4], %s155_s22, %s155_s22, %s156_s23  }
  0xca   :  { %152 = dma.done.wait [#allocation4], 256  }
  0xcb   :  { %153 = vsyncadd [#allocation4], 4294967040 }
  0xcc   :  { %94 = vsyncpa [#allocation3], 1 }
  0xcd   :  { %95 = vsyncpa [#allocation4], 1 }

</bundles_post_ra>
